<compile_context>
chip_gen: v5e
topology: v5e:2x2
jax: 0.10.0
libtpu: 0.0.40
codegen_flags: <defaults>
</compile_context>

<pallas_src>
import functools

import jax
import jax.numpy as jnp
from jax import lax
from jax.experimental import pallas as pl
from jax.experimental.pallas import tpu as pltpu

EPS = 1e-5
_VMEM_BUDGET = 40 * 1024 * 1024      # per-step working-set target (v7x-safe)
_VMEM_LIMIT = 48 * 1024 * 1024       # scoped VMEM limit handed to Mosaic


# ---------------------------------------------------------------------------
# Helpers (wrapper side)
# ---------------------------------------------------------------------------
def _pick_tl(L, bytes_per_len):
    """Largest length tile that divides L, is a multiple of 128 (or all of L)
    and keeps the per-step working set under the VMEM budget."""
    if L * bytes_per_len <= _VMEM_BUDGET:
        return L
    best = 0
    cand = 128
    while cand < L:
        if L % cand == 0 and cand * bytes_per_len <= _VMEM_BUDGET:
            best = cand
        cand += 128
    if best == 0:
        # TODO(synk): pad/mask a ragged length axis instead of falling back to
        #             a full-L block (only hit when L has no 128-multiple divisor).
        return L
    return best


def _make_halo(a_ncl, tl, nblk):
    """a_ncl: (N, C, L) -> (N*nblk, C, 2) [left, right] neighbour columns of
    every length tile; zeros at the true sequence boundaries (cheap XLA slices)."""
    N, C, L = a_ncl.shape
    ap = jnp.pad(a_ncl, ((0, 0), (0, 0), (1, 1)))
    left = ap[:, :, 0:L:tl]                      # (N, C, nblk)
    right = ap[:, :, tl + 1:L + 2:tl]            # (N, C, nblk)
    halo = jnp.stack([left, right], axis=-1)     # (N, C, nblk, 2)
    return jnp.transpose(halo, (0, 2, 1, 3)).reshape(N * nblk, C, 2)


def _scale_shift(st, gamma, beta, count):
    """Fold training-mode BN into per-channel (C, 1) scale/shift.
    st: (C, 2) = [sum, sum_sq] accumulated over the whole (N, L) batch."""
    mean = st[:, 0:1] / count
    var = jnp.maximum(st[:, 1:2] / count - mean * mean, 0.0)
    # TODO(synk): one-pass E[x^2]-E[x]^2 can cancel badly when |mean| >> std at
    #             very large N*L; switch to a shifted two-pass form if needed.
    scale = gamma.reshape(-1, 1) * lax.rsqrt(var + EPS)
    shift = beta.reshape(-1, 1) - mean * scale
    return scale, shift


# ---------------------------------------------------------------------------
# In-kernel building block
# ---------------------------------------------------------------------------
def _conv_taps(x_bf16, left, right):
    """x: (C, TL) bf16, left/right: (C, 1) bf16 halo columns.
    Returns the k=3 tap matrix (3*C, TL) for a single MXU contraction."""
    tl = x_bf16.shape[1]
    xp = jnp.concatenate([left, x_bf16, right], axis=1)               # (C, TL+2)
    # TODO(synk): for C >= 128 use three accumulated dots on pltpu.roll-shifted
    #             tiles instead of materialising the 3*C tap matrix.
    return jnp.concatenate(
        [xp[:, 0:tl], xp[:, 1:tl + 1], xp[:, 2:tl + 2]], axis=0)      # (3C, TL)


# ---------------------------------------------------------------------------
# Pass 1: conv1 (+ optional 1x1 shortcut conv) + merged partial BN stats
# ---------------------------------------------------------------------------
def _pass1_kernel_1x1(x_ref, h_ref, w1_ref, w3_ref, y1_ref, s_ref, st_ref):
    x = x_ref[0].astype(jnp.bfloat16)                   # (cin, TL)
    h = h_ref[0].astype(jnp.bfloat16)                   # (cin, 2) zero at seq ends
    xt = _conv_taps(x, h[:, 0:1], h[:, 1:2])            # (3*cin, TL)
    y1 = jnp.dot(w1_ref[...], xt, preferred_element_type=jnp.float32)   # (cmid, TL)
    s = jnp.dot(w3_ref[...], x, preferred_element_type=jnp.float32)     # (cmid, TL)
    y1_ref[0] = y1.astype(y1_ref.dtype)
    s_ref[0] = s.astype(s_ref.dtype)
    st_ref[0] = jnp.concatenate(
        [jnp.sum(y1, axis=1, keepdims=True),
         jnp.sum(y1 * y1, axis=1, keepdims=True),
         jnp.sum(s, axis=1, keepdims=True),
         jnp.sum(s * s, axis=1, keepdims=True)], axis=1)               # (cmid, 4)


def _pass1_kernel_id(x_ref, h_ref, w1_ref, y1_ref, st_ref):
    x = x_ref[0].astype(jnp.bfloat16)
    h = h_ref[0].astype(jnp.bfloat16)
    xt = _conv_taps(x, h[:, 0:1], h[:, 1:2])
    y1 = jnp.dot(w1_ref[...], xt, preferred_element_type=jnp.float32)
    y1_ref[0] = y1.astype(y1_ref.dtype)
    st_ref[0] = jnp.concatenate(
        [jnp.sum(y1, axis=1, keepdims=True),
         jnp.sum(y1 * y1, axis=1, keepdims=True)], axis=1)             # (cmid, 2)


# ---------------------------------------------------------------------------
# Pass 2: folded bn1 + ReLU + conv2 + partial BN stats
# ---------------------------------------------------------------------------
def _pass2_kernel(y1_ref, h_ref, sc1_ref, sh1_ref, w2_ref, y2_ref, st_ref):
    sc1 = sc1_ref[...]                                   # (cmid, 1)
    sh1 = sh1_ref[...]
    y = jnp.maximum(y1_ref[0].astype(jnp.float32) * sc1 + sh1, 0.0)    # (cmid, TL)
    h = jnp.maximum(h_ref[0].astype(jnp.float32) * sc1 + sh1, 0.0)     # (cmid, 2)
    # conv2's zero padding applies AFTER bn1+relu: zero the halo columns that
    # sit at the true sequence boundaries.
    li = pl.program_id(1)
    hl = jnp.where(li > 0, h[:, 0:1], 0.0)
    hr = jnp.where(li < pl.num_programs(1) - 1, h[:, 1:2], 0.0)
    yt = _conv_taps(y.astype(jnp.bfloat16),
                    hl.astype(jnp.bfloat16), hr.astype(jnp.bfloat16))   # (3cmid, TL)
    y2 = jnp.dot(w2_ref[...], yt, preferred_element_type=jnp.float32)   # (cmid, TL)
    y2_ref[0] = y2.astype(y2_ref.dtype)
    st_ref[0] = jnp.concatenate(
        [jnp.sum(y2, axis=1, keepdims=True),
         jnp.sum(y2 * y2, axis=1, keepdims=True)], axis=1)              # (cmid, 2)


# ---------------------------------------------------------------------------
# Pass 3: folded bn2 (+ bn3 shortcut) + residual add + ReLU
# ---------------------------------------------------------------------------
def _pass3_kernel_1x1(y2_ref, s_ref, sc2_ref, sh2_ref, sc3_ref, sh3_ref, o_ref):
    y2 = y2_ref[0].astype(jnp.float32) * sc2_ref[...] + sh2_ref[...]
    s = s_ref[0].astype(jnp.float32) * sc3_ref[...] + sh3_ref[...]
    o_ref[0] = jnp.maximum(y2 + s, 0.0).astype(o_ref.dtype)


def _pass3_kernel_id(y2_ref, x_ref, sc2_ref, sh2_ref, o_ref):
    y2 = y2_ref[0].astype(jnp.float32) * sc2_ref[...] + sh2_ref[...]
    o_ref[0] = jnp.maximum(y2 + x_ref[0].astype(jnp.float32), 0.0).astype(o_ref.dtype)


# ---------------------------------------------------------------------------
# Wrapper
# ---------------------------------------------------------------------------
@functools.partial(jax.jit, static_argnames=("use_1x1conv",))
def residual_forward(x_ncl, params, use_1x1conv=True):
    """x_ncl: (N, Cin, L) -> (N, Cout, L) float32 (PyTorch NCL layout, train-mode BN)."""
    x = x_ncl.astype(jnp.float32)
    N, cin, L = x.shape
    cmid = params["w1"].shape[2]
    count = jnp.float32(N * L)

    # Per-length-unit VMEM estimate (double-buffered blocks + in-kernel taps /
    # f32 matmul results) -> length tile bounded for v7x's 64 MiB.
    bytes_per_len = 16 * cin + 32 * cmid + 64
    TL = _pick_tl(L, bytes_per_len)
    nblk = L // TL
    grid = (N, nblk)

    # Fused-tap conv weights in (Cout, 3*Cin) layout, bf16 for the MXU.
    w1f = params["w1"].reshape(3 * cin, cmid).T.astype(jnp.bfloat16)    # (cmid, 3cin)
    w2f = params["w2"].reshape(3 * cmid, cmid).T.astype(jnp.bfloat16)   # (cmid, 3cmid)

    cp = pltpu.CompilerParams(
        dimension_semantics=("parallel", "arbitrary"),
        vmem_limit_bytes=_VMEM_LIMIT,
    )

    # Halo columns (left/right neighbours of every length tile) for conv1.
    x_halo = _make_halo(x, TL, nblk)                         # (N*nblk, cin, 2)

    blk_in = pl.BlockSpec((1, cin, TL), lambda n, l: (n, 0, l))
    blk_mid = pl.BlockSpec((1, cmid, TL), lambda n, l: (n, 0, l))
    blk_hx = pl.BlockSpec((1, cin, 2), lambda n, l: (n * nblk + l, 0, 0))
    blk_hm = pl.BlockSpec((1, cmid, 2), lambda n, l: (n * nblk + l, 0, 0))
    blk_w1 = pl.BlockSpec((cmid, 3 * cin), lambda n, l: (0, 0))
    blk_w2 = pl.BlockSpec((cmid, 3 * cmid), lambda n, l: (0, 0))
    blk_w3 = pl.BlockSpec((cmid, cin), lambda n, l: (0, 0))
    blk_vec = pl.BlockSpec((cmid, 1), lambda n, l: (0, 0))
    blk_st2 = pl.BlockSpec((1, cmid, 2), lambda n, l: (n * nblk + l, 0, 0))
    blk_st4 = pl.BlockSpec((1, cmid, 4), lambda n, l: (n * nblk + l, 0, 0))

    act_bf16 = jax.ShapeDtypeStruct((N, cmid, L), jnp.bfloat16)
    st2_sh = jax.ShapeDtypeStruct((N * nblk, cmid, 2), jnp.float32)
    st4_sh = jax.ShapeDtypeStruct((N * nblk, cmid, 4), jnp.float32)
    out_sh = jax.ShapeDtypeStruct((N, cmid, L), jnp.float32)

    # ---- pass 1: conv1 (+ 1x1 shortcut) + merged partial BN stats ----
    if use_1x1conv:
        w3t = params["w3"].T.astype(jnp.bfloat16)            # (cmid, cin)
        y1_raw, s_raw, st13 = pl.pallas_call(
            _pass1_kernel_1x1,
            grid=grid,
            in_specs=[blk_in, blk_hx, blk_w1, blk_w3],
            out_specs=(blk_mid, blk_mid, blk_st4),
            out_shape=(act_bf16, act_bf16, st4_sh),
            compiler_params=cp,
        )(x, x_halo, w1f, w3t)
        st13 = jnp.sum(st13, axis=0)                         # (cmid, 4)
        sc1, sh1 = _scale_shift(st13[:, 0:2], params["g1"], params["beta1"], count)
        sc3, sh3 = _scale_shift(st13[:, 2:4], params["g3"], params["beta3"], count)
    else:
        y1_raw, st1 = pl.pallas_call(
            _pass1_kernel_id,
            grid=grid,
            in_specs=[blk_in, blk_hx, blk_w1],
            out_specs=(blk_mid, blk_st2),
            out_shape=(act_bf16, st2_sh),
            compiler_params=cp,
        )(x, x_halo, w1f)
        sc1, sh1 = _scale_shift(jnp.sum(st1, axis=0), params["g1"], params["beta1"], count)

    # ---- pass 2: folded bn1 + relu + conv2 + partial BN stats ----
    y1_halo = _make_halo(y1_raw, TL, nblk)                   # (N*nblk, cmid, 2) bf16
    y2_raw, st2 = pl.pallas_call(
        _pass2_kernel,
        grid=grid,
        in_specs=[blk_mid, blk_hm, blk_vec, blk_vec, blk_w2],
        out_specs=(blk_mid, blk_st2),
        out_shape=(act_bf16, st2_sh),
        compiler_params=cp,
    )(y1_raw, y1_halo, sc1, sh1, w2f)
    sc2, sh2 = _scale_shift(jnp.sum(st2, axis=0), params["g2"], params["beta2"], count)

    # ---- pass 3: folded bn2 (+ bn3 shortcut) + residual add + relu ----
    # TODO(synk): pass 3 is pure elementwise; a larger TL and pl.Buffered(3)
    #             input specs would hide the remaining DMA latency.
    if use_1x1conv:
        out = pl.pallas_call(
            _pass3_kernel_1x1,
            grid=grid,
            in_specs=[blk_mid, blk_mid, blk_vec, blk_vec, blk_vec, blk_vec],
            out_specs=blk_mid,
            out_shape=out_sh,
            compiler_params=cp,
        )(y2_raw, s_raw, sc2, sh2, sc3, sh3)
    else:
        out = pl.pallas_call(
            _pass3_kernel_id,
            grid=grid,
            in_specs=[blk_mid, blk_in, blk_vec, blk_vec],
            out_specs=blk_mid,
            out_shape=out_sh,
            compiler_params=cp,
        )(y2_raw, x, sc2, sh2)
    return out


# ---------------------------------------------------------------------------
# Pure-JAX reference (verification only)
# ---------------------------------------------------------------------------
def _ref_forward(x_ncl, p, use_1x1conv):
    def conv1d_k3(x, w_kio, b):                              # w (3, Ci, Co)
        w_oik = jnp.transpose(w_kio, (2, 1, 0))              # (Co, Ci, 3)
        y = lax.conv_general_dilated(x, w_oik, window_strides=(1,),
                                     padding=((1, 1),),
                                     dimension_numbers=("NCH", "OIH", "NCH"))
        return y + b.reshape(1, -1, 1)

    def bn(y, g, b):
        mean = jnp.mean(y, axis=(0, 2), keepdims=True)
        var = jnp.mean((y - mean) ** 2, axis=(0, 2), keepdims=True)
        return (y - mean) / jnp.sqrt(var + EPS) * g.reshape(1, -1, 1) + b.reshape(1, -1, 1)

    Y = jax.nn.relu(bn(conv1d_k3(x_ncl, p["w1"], p["b1"]), p["g1"], p["beta1"]))
    Y = bn(conv1d_k3(Y, p["w2"], p["b2"]), p["g2"], p["beta2"])
    if use_1x1conv:
        X = jnp.einsum("ncl,co->nol", x_ncl, p["w3"]) + p["b3"].reshape(1, -1, 1)
        X = bn(X, p["g3"], p["beta3"])
    else:
        X = x_ncl
    return jax.nn.relu(Y + X)


# ---------------------------------------------------------------------------
# Demo
# ---------------------------------------------------------------------------
def _make_params(key, cin, cmid):
    ks = jax.random.split(key, 13)
    f32 = jnp.float32
    return {
        "w1": 0.3 * jax.random.normal(ks[0], (3, cin, cmid), f32),
        "b1": 0.1 * jax.random.normal(ks[1], (1, cmid), f32),
        "g1": 1.0 + 0.1 * jax.random.normal(ks[2], (1, cmid), f32),
        "beta1": 0.1 * jax.random.normal(ks[3], (1, cmid), f32),
        "w2": 0.3 * jax.random.normal(ks[4], (3, cmid, cmid), f32),
        "b2": 0.1 * jax.random.normal(ks[5], (1, cmid), f32),
        "g2": 1.0 + 0.1 * jax.random.normal(ks[6], (1, cmid), f32),
        "beta2": 0.1 * jax.random.normal(ks[7], (1, cmid), f32),
        "w3": 0.3 * jax.random.normal(ks[8], (cin, cmid), f32),
        "b3": 0.1 * jax.random.normal(ks[9], (1, cmid), f32),
        "g3": 1.0 + 0.1 * jax.random.normal(ks[10], (1, cmid), f32),
        "beta3": 0.1 * jax.random.normal(ks[11], (1, cmid), f32),
    }


if __name__ == "__main__":
    key = jax.random.PRNGKey(0)
    k_x, k_p, k_x2 = jax.random.split(key, 3)

    # Case 1: use_1x1conv=True (input_channels=4 -> num_channels=8, L=16)
    N, CIN, CMID, L = 2, 4, 8, 16
    params = _make_params(k_p, CIN, CMID)
    x = jax.random.normal(k_x, (N, CIN, L), jnp.float32)
    out = jax.block_until_ready(residual_forward(x, params, use_1x1conv=True))
    ref = _ref_forward(x, params, True)
    assert out.shape == (N, CMID, L)
    # bf16 MXU operands + bf16 inter-pass activations -> loosened tolerance.
    assert jnp.allclose(out, ref, rtol=5e-2, atol=5e-2), "mismatch (1x1conv path)"

    # Case 2: use_1x1conv=False (identity shortcut, input_channels == num_channels)
    params_id = _make_params(k_p, CMID, CMID)
    x2 = jax.random.normal(k_x2, (N, CMID, L), jnp.float32)
    out2 = jax.block_until_ready(residual_forward(x2, params_id, use_1x1conv=False))
    ref2 = _ref_forward(x2, params_id, False)
    assert jnp.allclose(out2, ref2, rtol=5e-2, atol=5e-2), "mismatch (identity path)"

    print("KERNEL_OK")
</pallas_src>

<mosaic_0001>
module attributes {stable_mosaic.version = 11 : i64} {
  func.func @_pass1_kernel_1x1(%arg0: i32, %arg1: i32, %arg2: memref<1x4x16xf32, #tpu.memory_space<vmem>>, %arg3: memref<1x4x2xf32, #tpu.memory_space<vmem>>, %arg4: memref<8x12xbf16, #tpu.memory_space<vmem>>, %arg5: memref<8x4xbf16, #tpu.memory_space<vmem>>, %arg6: memref<1x8x16xbf16, #tpu.memory_space<vmem>>, %arg7: memref<1x8x16xbf16, #tpu.memory_space<vmem>>, %arg8: memref<1x8x4xf32, #tpu.memory_space<vmem>>) attributes {dimension_semantics = [#tpu.dimension_semantics<parallel>, #tpu.dimension_semantics<arbitrary>], iteration_bounds = array<i64: 2, 1>, scalar_prefetch = 0 : i64, scratch_operands = 0 : i64, tpu.core_type = #tpu.core_type<tc>, window_params = [{transform_indices = @transform_0, window_bounds = array<i64: 1, 4, 16>}, {transform_indices = @transform_1, window_bounds = array<i64: 1, 4, 2>}, {pipeline_mode = #tpu.pipeline_mode<synchronous>, transform_indices = @transform_2, window_bounds = array<i64: 8, 12>}, {pipeline_mode = #tpu.pipeline_mode<synchronous>, transform_indices = @transform_3, window_bounds = array<i64: 8, 4>}, {transform_indices = @transform_4, window_bounds = array<i64: 1, 8, 16>}, {transform_indices = @transform_5, window_bounds = array<i64: 1, 8, 16>}, {transform_indices = @transform_6, window_bounds = array<i64: 1, 8, 4>}]} {
    %c0 = arith.constant 0 : index
    %c0_0 = arith.constant 0 : index
    %c0_1 = arith.constant 0 : index
    %0 = vector.load %arg2[%c0, %c0_0, %c0_1] : memref<1x4x16xf32, #tpu.memory_space<vmem>>, vector<1x4x16xf32>
    %1 = vector.shape_cast %0 : vector<1x4x16xf32> to vector<4x16xf32>
    %2 = arith.truncf %1 : vector<4x16xf32> to vector<4x16xbf16>
    %c0_2 = arith.constant 0 : index
    %c0_3 = arith.constant 0 : index
    %c0_4 = arith.constant 0 : index
    %3 = vector.load %arg3[%c0_2, %c0_3, %c0_4] : memref<1x4x2xf32, #tpu.memory_space<vmem>>, vector<1x4x2xf32>
    %4 = vector.shape_cast %3 : vector<1x4x2xf32> to vector<4x2xf32>
    %5 = arith.truncf %4 : vector<4x2xf32> to vector<4x2xbf16>
    %6 = vector.extract_strided_slice %5 {offsets = [0, 0], sizes = [4, 1], strides = [1, 1]} : vector<4x2xbf16> to vector<4x1xbf16>
    %7 = vector.extract_strided_slice %5 {offsets = [0, 1], sizes = [4, 1], strides = [1, 1]} : vector<4x2xbf16> to vector<4x1xbf16>
    %8 = tpu.concatenate %6, %2, %7 in 1 : vector<4x1xbf16>, vector<4x16xbf16>, vector<4x1xbf16> -> vector<4x18xbf16>
    %9 = vector.extract_strided_slice %8 {offsets = [0, 0], sizes = [4, 16], strides = [1, 1]} : vector<4x18xbf16> to vector<4x16xbf16>
    %10 = vector.extract_strided_slice %8 {offsets = [0, 1], sizes = [4, 16], strides = [1, 1]} : vector<4x18xbf16> to vector<4x16xbf16>
    %11 = vector.extract_strided_slice %8 {offsets = [0, 2], sizes = [4, 16], strides = [1, 1]} : vector<4x18xbf16> to vector<4x16xbf16>
    %12 = tpu.concatenate %9, %10, %11 in 0 : vector<4x16xbf16>, vector<4x16xbf16>, vector<4x16xbf16> -> vector<12x16xbf16>
    %c0_5 = arith.constant 0 : index
    %c0_6 = arith.constant 0 : index
    %13 = vector.load %arg4[%c0_5, %c0_6] : memref<8x12xbf16, #tpu.memory_space<vmem>>, vector<8x12xbf16>
    %cst = arith.constant dense<0.000000e+00> : vector<8x16xf32>
    %14 = tpu.matmul %13, %12, %cst {dimension_numbers = #tpu.dot_dimension_numbers<[1], [0], [0], [1], [0, 0, 1, 1], [], []>} : vector<8x12xbf16>, vector<12x16xbf16>, vector<8x16xf32> -> vector<8x16xf32>
    %c0_7 = arith.constant 0 : index
    %c0_8 = arith.constant 0 : index
    %15 = vector.load %arg5[%c0_7, %c0_8] : memref<8x4xbf16, #tpu.memory_space<vmem>>, vector<8x4xbf16>
    %cst_9 = arith.constant dense<0.000000e+00> : vector<8x16xf32>
    %16 = tpu.matmul %15, %2, %cst_9 {dimension_numbers = #tpu.dot_dimension_numbers<[1], [0], [0], [1], [0, 0, 1, 1], [], []>} : vector<8x4xbf16>, vector<4x16xbf16>, vector<8x16xf32> -> vector<8x16xf32>
    %17 = arith.truncf %14 : vector<8x16xf32> to vector<8x16xbf16>
    %c0_10 = arith.constant 0 : index
    %c0_11 = arith.constant 0 : index
    %c0_12 = arith.constant 0 : index
    %18 = vector.load %arg6[%c0_10, %c0_11, %c0_12] : memref<1x8x16xbf16, #tpu.memory_space<vmem>>, vector<1x8x16xbf16>
    %19 = vector.shape_cast %18 : vector<1x8x16xbf16> to vector<8x16xbf16>
    %20 = vector.shape_cast %17 : vector<8x16xbf16> to vector<1x8x16xbf16>
    tpu.vector_store %arg6[%c0_10, %c0_11, %c0_12], %20 {strides = array<i32>} : memref<1x8x16xbf16, #tpu.memory_space<vmem>>, vector<1x8x16xbf16>,
    %21 = arith.truncf %16 : vector<8x16xf32> to vector<8x16xbf16>
    %c0_13 = arith.constant 0 : index
    %c0_14 = arith.constant 0 : index
    %c0_15 = arith.constant 0 : index
    %22 = vector.load %arg7[%c0_13, %c0_14, %c0_15] : memref<1x8x16xbf16, #tpu.memory_space<vmem>>, vector<1x8x16xbf16>
    %23 = vector.shape_cast %22 : vector<1x8x16xbf16> to vector<8x16xbf16>
    %24 = vector.shape_cast %21 : vector<8x16xbf16> to vector<1x8x16xbf16>
    tpu.vector_store %arg7[%c0_13, %c0_14, %c0_15], %24 {strides = array<i32>} : memref<1x8x16xbf16, #tpu.memory_space<vmem>>, vector<1x8x16xbf16>,
    %cst_16 = arith.constant dense<0.000000e+00> : vector<8xf32>
    %25 = vector.multi_reduction <add>, %14, %cst_16 [1] : vector<8x16xf32> to vector<8xf32>
    %26 = vector.shape_cast %25 : vector<8xf32> to vector<8x1xf32>
    %27 = arith.mulf %14, %14 : vector<8x16xf32>
    %cst_17 = arith.constant dense<0.000000e+00> : vector<8xf32>
    %28 = vector.multi_reduction <add>, %27, %cst_17 [1] : vector<8x16xf32> to vector<8xf32>
    %29 = vector.shape_cast %28 : vector<8xf32> to vector<8x1xf32>
    %cst_18 = arith.constant dense<0.000000e+00> : vector<8xf32>
    %30 = vector.multi_reduction <add>, %16, %cst_18 [1] : vector<8x16xf32> to vector<8xf32>
    %31 = vector.shape_cast %30 : vector<8xf32> to vector<8x1xf32>
    %32 = arith.mulf %16, %16 : vector<8x16xf32>
    %cst_19 = arith.constant dense<0.000000e+00> : vector<8xf32>
    %33 = vector.multi_reduction <add>, %32, %cst_19 [1] : vector<8x16xf32> to vector<8xf32>
    %34 = vector.shape_cast %33 : vector<8xf32> to vector<8x1xf32>
    %35 = tpu.concatenate %26, %29, %31, %34 in 1 : vector<8x1xf32>, vector<8x1xf32>, vector<8x1xf32>, vector<8x1xf32> -> vector<8x4xf32>
    %c0_20 = arith.constant 0 : index
    %c0_21 = arith.constant 0 : index
    %c0_22 = arith.constant 0 : index
    %36 = vector.load %arg8[%c0_20, %c0_21, %c0_22] : memref<1x8x4xf32, #tpu.memory_space<vmem>>, vector<1x8x4xf32>
    %37 = vector.shape_cast %36 : vector<1x8x4xf32> to vector<8x4xf32>
    %38 = vector.shape_cast %35 : vector<8x4xf32> to vector<1x8x4xf32>
    tpu.vector_store %arg8[%c0_20, %c0_21, %c0_22], %38 {strides = array<i32>} : memref<1x8x4xf32, #tpu.memory_space<vmem>>, vector<1x8x4xf32>,
    return
  }
  func.func @transform_0(%arg0: i32, %arg1: i32) -> (i32, i32, i32) {
    %c0_i32 = arith.constant 0 : i32
    %c0_i32_0 = arith.constant 0 : i32
    return %arg0, %c0_i32, %arg1 : i32, i32, i32
  }
  func.func @transform_1(%arg0: i32, %arg1: i32) -> (i32, i32, i32) {
    %c1_i32 = arith.constant 1 : i32
    %0 = arith.muli %arg0, %c1_i32 : i32
    %1 = arith.addi %0, %arg1 : i32
    %c0_i32 = arith.constant 0 : i32
    %c0_i32_0 = arith.constant 0 : i32
    %c0_i32_1 = arith.constant 0 : i32
    return %1, %c0_i32, %c0_i32_0 : i32, i32, i32
  }
  func.func @transform_2(%arg0: i32, %arg1: i32) -> (i32, i32) {
    %c0_i32 = arith.constant 0 : i32
    %c0_i32_0 = arith.constant 0 : i32
    %c0_i32_1 = arith.constant 0 : i32
    return %c0_i32, %c0_i32_0 : i32, i32
  }
  func.func @transform_3(%arg0: i32, %arg1: i32) -> (i32, i32) {
    %c0_i32 = arith.constant 0 : i32
    %c0_i32_0 = arith.constant 0 : i32
    %c0_i32_1 = arith.constant 0 : i32
    return %c0_i32, %c0_i32_0 : i32, i32
  }
  func.func @transform_4(%arg0: i32, %arg1: i32) -> (i32, i32, i32) {
    %c0_i32 = arith.constant 0 : i32
    %c0_i32_0 = arith.constant 0 : i32
    return %arg0, %c0_i32, %arg1 : i32, i32, i32
  }
  func.func @transform_5(%arg0: i32, %arg1: i32) -> (i32, i32, i32) {
    %c0_i32 = arith.constant 0 : i32
    %c0_i32_0 = arith.constant 0 : i32
    return %arg0, %c0_i32, %arg1 : i32, i32, i32
  }
  func.func @transform_6(%arg0: i32, %arg1: i32) -> (i32, i32, i32) {
    %c1_i32 = arith.constant 1 : i32
    %0 = arith.muli %arg0, %c1_i32 : i32
    %1 = arith.addi %0, %arg1 : i32
    %c0_i32 = arith.constant 0 : i32
    %c0_i32_0 = arith.constant 0 : i32
    %c0_i32_1 = arith.constant 0 : i32
    return %1, %c0_i32, %c0_i32_0 : i32, i32, i32
  }
}

module attributes {stable_mosaic.version = 11 : i64} {
  func.func @_pass2_kernel(%arg0: i32, %arg1: i32, %arg2: memref<1x8x16xbf16, #tpu.memory_space<vmem>>, %arg3: memref<1x8x2xbf16, #tpu.memory_space<vmem>>, %arg4: memref<8x1xf32, #tpu.memory_space<vmem>>, %arg5: memref<8x1xf32, #tpu.memory_space<vmem>>, %arg6: memref<8x24xbf16, #tpu.memory_space<vmem>>, %arg7: memref<1x8x16xbf16, #tpu.memory_space<vmem>>, %arg8: memref<1x8x2xf32, #tpu.memory_space<vmem>>) attributes {dimension_semantics = [#tpu.dimension_semantics<parallel>, #tpu.dimension_semantics<arbitrary>], iteration_bounds = array<i64: 2, 1>, scalar_prefetch = 0 : i64, scratch_operands = 0 : i64, tpu.core_type = #tpu.core_type<tc>, window_params = [{transform_indices = @transform_0, window_bounds = array<i64: 1, 8, 16>}, {transform_indices = @transform_1, window_bounds = array<i64: 1, 8, 2>}, {pipeline_mode = #tpu.pipeline_mode<synchronous>, transform_indices = @transform_2, window_bounds = array<i64: 8, 1>}, {pipeline_mode = #tpu.pipeline_mode<synchronous>, transform_indices = @transform_3, window_bounds = array<i64: 8, 1>}, {pipeline_mode = #tpu.pipeline_mode<synchronous>, transform_indices = @transform_4, window_bounds = array<i64: 8, 24>}, {transform_indices = @transform_5, window_bounds = array<i64: 1, 8, 16>}, {transform_indices = @transform_6, window_bounds = array<i64: 1, 8, 2>}]} {
    %c0 = arith.constant 0 : index
    %c0_0 = arith.constant 0 : index
    %0 = vector.load %arg4[%c0, %c0_0] : memref<8x1xf32, #tpu.memory_space<vmem>>, vector<8x1xf32>
    %c0_1 = arith.constant 0 : index
    %c0_2 = arith.constant 0 : index
    %1 = vector.load %arg5[%c0_1, %c0_2] : memref<8x1xf32, #tpu.memory_space<vmem>>, vector<8x1xf32>
    %c0_3 = arith.constant 0 : index
    %c0_4 = arith.constant 0 : index
    %c0_5 = arith.constant 0 : index
    %2 = vector.load %arg2[%c0_3, %c0_4, %c0_5] : memref<1x8x16xbf16, #tpu.memory_space<vmem>>, vector<1x8x16xbf16>
    %3 = vector.shape_cast %2 : vector<1x8x16xbf16> to vector<8x16xbf16>
    %4 = arith.extf %3 : vector<8x16xbf16> to vector<8x16xf32>
    %5 = vector.broadcast %0 : vector<8x1xf32> to vector<8x16xf32>
    %6 = arith.mulf %4, %5 : vector<8x16xf32>
    %7 = vector.broadcast %1 : vector<8x1xf32> to vector<8x16xf32>
    %8 = arith.addf %6, %7 : vector<8x16xf32>
    %cst = arith.constant 0.000000e+00 : f32
    %9 = vector.broadcast %cst : f32 to vector<8x16xf32>
    %10 = arith.maximumf %8, %9 : vector<8x16xf32>
    %c0_6 = arith.constant 0 : index
    %c0_7 = arith.constant 0 : index
    %c0_8 = arith.constant 0 : index
    %11 = vector.load %arg3[%c0_6, %c0_7, %c0_8] : memref<1x8x2xbf16, #tpu.memory_space<vmem>>, vector<1x8x2xbf16>
    %12 = vector.shape_cast %11 : vector<1x8x2xbf16> to vector<8x2xbf16>
    %13 = arith.extf %12 : vector<8x2xbf16> to vector<8x2xf32>
    %14 = vector.broadcast %0 : vector<8x1xf32> to vector<8x2xf32>
    %15 = arith.mulf %13, %14 : vector<8x2xf32>
    %16 = vector.broadcast %1 : vector<8x1xf32> to vector<8x2xf32>
    %17 = arith.addf %15, %16 : vector<8x2xf32>
    %cst_9 = arith.constant 0.000000e+00 : f32
    %18 = vector.broadcast %cst_9 : f32 to vector<8x2xf32>
    %19 = arith.maximumf %17, %18 : vector<8x2xf32>
    %c0_i32 = arith.constant 0 : i32
    %20 = arith.cmpi sgt, %arg1, %c0_i32 : i32
    %21 = vector.extract_strided_slice %19 {offsets = [0, 0], sizes = [8, 1], strides = [1, 1]} : vector<8x2xf32> to vector<8x1xf32>
    %cst_10 = arith.constant 0.000000e+00 : f32
    %22 = vector.broadcast %cst_10 : f32 to vector<8x1xf32>
    %23 = arith.select %20, %21, %22 : vector<8x1xf32>
    %c0_i32_11 = arith.constant 0 : i32
    %24 = arith.cmpi slt, %arg1, %c0_i32_11 : i32
    %25 = vector.extract_strided_slice %19 {offsets = [0, 1], sizes = [8, 1], strides = [1, 1]} : vector<8x2xf32> to vector<8x1xf32>
    %cst_12 = arith.constant 0.000000e+00 : f32
    %26 = vector.broadcast %cst_12 : f32 to vector<8x1xf32>
    %27 = arith.select %24, %25, %26 : vector<8x1xf32>
    %28 = arith.truncf %10 : vector<8x16xf32> to vector<8x16xbf16>
    %29 = arith.truncf %23 : vector<8x1xf32> to vector<8x1xbf16>
    %30 = arith.truncf %27 : vector<8x1xf32> to vector<8x1xbf16>
    %31 = tpu.concatenate %29, %28, %30 in 1 : vector<8x1xbf16>, vector<8x16xbf16>, vector<8x1xbf16> -> vector<8x18xbf16>
    %32 = vector.extract_strided_slice %31 {offsets = [0, 0], sizes = [8, 16], strides = [1, 1]} : vector<8x18xbf16> to vector<8x16xbf16>
    %33 = vector.extract_strided_slice %31 {offsets = [0, 1], sizes = [8, 16], strides = [1, 1]} : vector<8x18xbf16> to vector<8x16xbf16>
    %34 = vector.extract_strided_slice %31 {offsets = [0, 2], sizes = [8, 16], strides = [1, 1]} : vector<8x18xbf16> to vector<8x16xbf16>
    %35 = tpu.concatenate %32, %33, %34 in 0 : vector<8x16xbf16>, vector<8x16xbf16>, vector<8x16xbf16> -> vector<24x16xbf16>
    %c0_13 = arith.constant 0 : index
    %c0_14 = arith.constant 0 : index
    %36 = vector.load %arg6[%c0_13, %c0_14] : memref<8x24xbf16, #tpu.memory_space<vmem>>, vector<8x24xbf16>
    %cst_15 = arith.constant dense<0.000000e+00> : vector<8x16xf32>
    %37 = tpu.matmul %36, %35, %cst_15 {dimension_numbers = #tpu.dot_dimension_numbers<[1], [0], [0], [1], [0, 0, 1, 1], [], []>} : vector<8x24xbf16>, vector<24x16xbf16>, vector<8x16xf32> -> vector<8x16xf32>
    %38 = arith.truncf %37 : vector<8x16xf32> to vector<8x16xbf16>
    %c0_16 = arith.constant 0 : index
    %c0_17 = arith.constant 0 : index
    %c0_18 = arith.constant 0 : index
    %39 = vector.load %arg7[%c0_16, %c0_17, %c0_18] : memref<1x8x16xbf16, #tpu.memory_space<vmem>>, vector<1x8x16xbf16>
    %40 = vector.shape_cast %39 : vector<1x8x16xbf16> to vector<8x16xbf16>
    %41 = vector.shape_cast %38 : vector<8x16xbf16> to vector<1x8x16xbf16>
    tpu.vector_store %arg7[%c0_16, %c0_17, %c0_18], %41 {strides = array<i32>} : memref<1x8x16xbf16, #tpu.memory_space<vmem>>, vector<1x8x16xbf16>,
    %cst_19 = arith.constant dense<0.000000e+00> : vector<8xf32>
    %42 = vector.multi_reduction <add>, %37, %cst_19 [1] : vector<8x16xf32> to vector<8xf32>
    %43 = vector.shape_cast %42 : vector<8xf32> to vector<8x1xf32>
    %44 = arith.mulf %37, %37 : vector<8x16xf32>
    %cst_20 = arith.constant dense<0.000000e+00> : vector<8xf32>
    %45 = vector.multi_reduction <add>, %44, %cst_20 [1] : vector<8x16xf32> to vector<8xf32>
    %46 = vector.shape_cast %45 : vector<8xf32> to vector<8x1xf32>
    %47 = tpu.concatenate %43, %46 in 1 : vector<8x1xf32>, vector<8x1xf32> -> vector<8x2xf32>
    %c0_21 = arith.constant 0 : index
    %c0_22 = arith.constant 0 : index
    %c0_23 = arith.constant 0 : index
    %48 = vector.load %arg8[%c0_21, %c0_22, %c0_23] : memref<1x8x2xf32, #tpu.memory_space<vmem>>, vector<1x8x2xf32>
    %49 = vector.shape_cast %48 : vector<1x8x2xf32> to vector<8x2xf32>
    %50 = vector.shape_cast %47 : vector<8x2xf32> to vector<1x8x2xf32>
    tpu.vector_store %arg8[%c0_21, %c0_22, %c0_23], %50 {strides = array<i32>} : memref<1x8x2xf32, #tpu.memory_space<vmem>>, vector<1x8x2xf32>,
    return
  }
  func.func @transform_0(%arg0: i32, %arg1: i32) -> (i32, i32, i32) {
    %c0_i32 = arith.constant 0 : i32
    %c0_i32_0 = arith.constant 0 : i32
    return %arg0, %c0_i32, %arg1 : i32, i32, i32
  }
  func.func @transform_1(%arg0: i32, %arg1: i32) -> (i32, i32, i32) {
    %c1_i32 = arith.constant 1 : i32
    %0 = arith.muli %arg0, %c1_i32 : i32
    %1 = arith.addi %0, %arg1 : i32
    %c0_i32 = arith.constant 0 : i32
    %c0_i32_0 = arith.constant 0 : i32
    %c0_i32_1 = arith.constant 0 : i32
    return %1, %c0_i32, %c0_i32_0 : i32, i32, i32
  }
  func.func @transform_2(%arg0: i32, %arg1: i32) -> (i32, i32) {
    %c0_i32 = arith.constant 0 : i32
    %c0_i32_0 = arith.constant 0 : i32
    %c0_i32_1 = arith.constant 0 : i32
    return %c0_i32, %c0_i32_0 : i32, i32
  }
  func.func @transform_3(%arg0: i32, %arg1: i32) -> (i32, i32) {
    %c0_i32 = arith.constant 0 : i32
    %c0_i32_0 = arith.constant 0 : i32
    %c0_i32_1 = arith.constant 0 : i32
    return %c0_i32, %c0_i32_0 : i32, i32
  }
  func.func @transform_4(%arg0: i32, %arg1: i32) -> (i32, i32) {
    %c0_i32 = arith.constant 0 : i32
    %c0_i32_0 = arith.constant 0 : i32
    %c0_i32_1 = arith.constant 0 : i32
    return %c0_i32, %c0_i32_0 : i32, i32
  }
  func.func @transform_5(%arg0: i32, %arg1: i32) -> (i32, i32, i32) {
    %c0_i32 = arith.constant 0 : i32
    %c0_i32_0 = arith.constant 0 : i32
    return %arg0, %c0_i32, %arg1 : i32, i32, i32
  }
  func.func @transform_6(%arg0: i32, %arg1: i32) -> (i32, i32, i32) {
    %c1_i32 = arith.constant 1 : i32
    %0 = arith.muli %arg0, %c1_i32 : i32
    %1 = arith.addi %0, %arg1 : i32
    %c0_i32 = arith.constant 0 : i32
    %c0_i32_0 = arith.constant 0 : i32
    %c0_i32_1 = arith.constant 0 : i32
    return %1, %c0_i32, %c0_i32_0 : i32, i32, i32
  }
}

module attributes {stable_mosaic.version = 11 : i64} {
  func.func @_pass3_kernel_1x1(%arg0: i32, %arg1: i32, %arg2: memref<1x8x16xbf16, #tpu.memory_space<vmem>>, %arg3: memref<1x8x16xbf16, #tpu.memory_space<vmem>>, %arg4: memref<8x1xf32, #tpu.memory_space<vmem>>, %arg5: memref<8x1xf32, #tpu.memory_space<vmem>>, %arg6: memref<8x1xf32, #tpu.memory_space<vmem>>, %arg7: memref<8x1xf32, #tpu.memory_space<vmem>>, %arg8: memref<1x8x16xf32, #tpu.memory_space<vmem>>) attributes {dimension_semantics = [#tpu.dimension_semantics<parallel>, #tpu.dimension_semantics<arbitrary>], iteration_bounds = array<i64: 2, 1>, scalar_prefetch = 0 : i64, scratch_operands = 0 : i64, tpu.core_type = #tpu.core_type<tc>, window_params = [{transform_indices = @transform_0, window_bounds = array<i64: 1, 8, 16>}, {transform_indices = @transform_1, window_bounds = array<i64: 1, 8, 16>}, {pipeline_mode = #tpu.pipeline_mode<synchronous>, transform_indices = @transform_2, window_bounds = array<i64: 8, 1>}, {pipeline_mode = #tpu.pipeline_mode<synchronous>, transform_indices = @transform_3, window_bounds = array<i64: 8, 1>}, {pipeline_mode = #tpu.pipeline_mode<synchronous>, transform_indices = @transform_4, window_bounds = array<i64: 8, 1>}, {pipeline_mode = #tpu.pipeline_mode<synchronous>, transform_indices = @transform_5, window_bounds = array<i64: 8, 1>}, {transform_indices = @transform_6, window_bounds = array<i64: 1, 8, 16>}]} {
    %c0 = arith.constant 0 : index
    %c0_0 = arith.constant 0 : index
    %c0_1 = arith.constant 0 : index
    %0 = vector.load %arg2[%c0, %c0_0, %c0_1] : memref<1x8x16xbf16, #tpu.memory_space<vmem>>, vector<1x8x16xbf16>
    %1 = vector.shape_cast %0 : vector<1x8x16xbf16> to vector<8x16xbf16>
    %2 = arith.extf %1 : vector<8x16xbf16> to vector<8x16xf32>
    %c0_2 = arith.constant 0 : index
    %c0_3 = arith.constant 0 : index
    %3 = vector.load %arg4[%c0_2, %c0_3] : memref<8x1xf32, #tpu.memory_space<vmem>>, vector<8x1xf32>
    %4 = vector.broadcast %3 : vector<8x1xf32> to vector<8x16xf32>
    %5 = arith.mulf %2, %4 : vector<8x16xf32>
    %c0_4 = arith.constant 0 : index
    %c0_5 = arith.constant 0 : index
    %6 = vector.load %arg5[%c0_4, %c0_5] : memref<8x1xf32, #tpu.memory_space<vmem>>, vector<8x1xf32>
    %7 = vector.broadcast %6 : vector<8x1xf32> to vector<8x16xf32>
    %8 = arith.addf %5, %7 : vector<8x16xf32>
    %c0_6 = arith.constant 0 : index
    %c0_7 = arith.constant 0 : index
    %c0_8 = arith.constant 0 : index
    %9 = vector.load %arg3[%c0_6, %c0_7, %c0_8] : memref<1x8x16xbf16, #tpu.memory_space<vmem>>, vector<1x8x16xbf16>
    %10 = vector.shape_cast %9 : vector<1x8x16xbf16> to vector<8x16xbf16>
    %11 = arith.extf %10 : vector<8x16xbf16> to vector<8x16xf32>
    %c0_9 = arith.constant 0 : index
    %c0_10 = arith.constant 0 : index
    %12 = vector.load %arg6[%c0_9, %c0_10] : memref<8x1xf32, #tpu.memory_space<vmem>>, vector<8x1xf32>
    %13 = vector.broadcast %12 : vector<8x1xf32> to vector<8x16xf32>
    %14 = arith.mulf %11, %13 : vector<8x16xf32>
    %c0_11 = arith.constant 0 : index
    %c0_12 = arith.constant 0 : index
    %15 = vector.load %arg7[%c0_11, %c0_12] : memref<8x1xf32, #tpu.memory_space<vmem>>, vector<8x1xf32>
    %16 = vector.broadcast %15 : vector<8x1xf32> to vector<8x16xf32>
    %17 = arith.addf %14, %16 : vector<8x16xf32>
    %18 = arith.addf %8, %17 : vector<8x16xf32>
    %cst = arith.constant 0.000000e+00 : f32
    %19 = vector.broadcast %cst : f32 to vector<8x16xf32>
    %20 = arith.maximumf %18, %19 : vector<8x16xf32>
    %c0_13 = arith.constant 0 : index
    %c0_14 = arith.constant 0 : index
    %c0_15 = arith.constant 0 : index
    %21 = vector.load %arg8[%c0_13, %c0_14, %c0_15] : memref<1x8x16xf32, #tpu.memory_space<vmem>>, vector<1x8x16xf32>
    %22 = vector.shape_cast %21 : vector<1x8x16xf32> to vector<8x16xf32>
    %23 = vector.shape_cast %20 : vector<8x16xf32> to vector<1x8x16xf32>
    tpu.vector_store %arg8[%c0_13, %c0_14, %c0_15], %23 {strides = array<i32>} : memref<1x8x16xf32, #tpu.memory_space<vmem>>, vector<1x8x16xf32>,
    return
  }
  func.func @transform_0(%arg0: i32, %arg1: i32) -> (i32, i32, i32) {
    %c0_i32 = arith.constant 0 : i32
    %c0_i32_0 = arith.constant 0 : i32
    return %arg0, %c0_i32, %arg1 : i32, i32, i32
  }
  func.func @transform_1(%arg0: i32, %arg1: i32) -> (i32, i32, i32) {
    %c0_i32 = arith.constant 0 : i32
    %c0_i32_0 = arith.constant 0 : i32
    return %arg0, %c0_i32, %arg1 : i32, i32, i32
  }
  func.func @transform_2(%arg0: i32, %arg1: i32) -> (i32, i32) {
    %c0_i32 = arith.constant 0 : i32
    %c0_i32_0 = arith.constant 0 : i32
    %c0_i32_1 = arith.constant 0 : i32
    return %c0_i32, %c0_i32_0 : i32, i32
  }
  func.func @transform_3(%arg0: i32, %arg1: i32) -> (i32, i32) {
    %c0_i32 = arith.constant 0 : i32
    %c0_i32_0 = arith.constant 0 : i32
    %c0_i32_1 = arith.constant 0 : i32
    return %c0_i32, %c0_i32_0 : i32, i32
  }
  func.func @transform_4(%arg0: i32, %arg1: i32) -> (i32, i32) {
    %c0_i32 = arith.constant 0 : i32
    %c0_i32_0 = arith.constant 0 : i32
    %c0_i32_1 = arith.constant 0 : i32
    return %c0_i32, %c0_i32_0 : i32, i32
  }
  func.func @transform_5(%arg0: i32, %arg1: i32) -> (i32, i32) {
    %c0_i32 = arith.constant 0 : i32
    %c0_i32_0 = arith.constant 0 : i32
    %c0_i32_1 = arith.constant 0 : i32
    return %c0_i32, %c0_i32_0 : i32, i32
  }
  func.func @transform_6(%arg0: i32, %arg1: i32) -> (i32, i32, i32) {
    %c0_i32 = arith.constant 0 : i32
    %c0_i32_0 = arith.constant 0 : i32
    return %arg0, %c0_i32, %arg1 : i32, i32, i32
  }
}

</mosaic_0001>

<bundles_post_ra>
// kernel: residual_forward.5
= control target key start
LH: loop header
LB: loop body
LE: loop exit
PB: predicated region body
PF: predicated region fallthrough
CT: control target
= control target key end

     0   :  { %11 = vsyncpa [#allocation3], 0  ;;  %s737_s0 = inlined_call_operand.vmem [shape: bf16[2,8,16], index: 0, kind: input, shape index: {}]   ;;  %s738_s1 = inlined_call_operand.vmem [shape: bf16[2,8,16], index: 1, kind: input, shape index: {}]   ;;  %s739_s2 = inlined_call_operand.vmem [shape: f32[8,1], index: 2, kind: input, shape index: {}]   ;;  %s740_s3 = inlined_call_operand.vmem [shape: f32[8,1], index: 3, kind: input, shape index: {}]   ;;  %s741_s4 = inlined_call_operand.vmem [shape: f32[8,1], index: 4, kind: input, shape index: {}]   ;;  %s742_s5 = inlined_call_operand.vmem [shape: f32[8,1], index: 5, kind: input, shape index: {}]   ;;  %s743_s6 = inlined_call_operand.hbm [shape: f32[2,8,16], index: 6, kind: output, shape index: {}]  }
   0x1   :  { %13 = vsyncpa [#allocation3 + $0x1], 0  ;;  %s625_s21 = smov 0   ;;  %s627_s22 = smov 0  }
   0x2   :  { %s629_s23 = smov 0   ;;  %s631_s24 = smov 0  }
   0x3   :  { %s633_s25 = smov 0   ;;  %s635_s26 = smov 0  }
   0x4 LB: > { %s439_s27 = sadd.s32 4294967295, %s587_s26   ;;  %s440_s28 = sadd.s32 4294967294, %s587_s26   ;;  %s587_s26 = sphi %s635_s26, %s19_s26   ;;  %s583_s25 = sphi %s633_s25, %s750_s25   ;;  %s579_s24 = sphi %s631_s24, %s749_s24   ;;  %s575_s23 = sphi %s629_s23, %s748_s23   ;;  %s571_s22 = sphi %s627_s22, %s747_s22   ;;  %s567_s21 = sphi %s625_s21, %s746_s21  }
   0x5   : > { %s31_s29 = sadd.s32 1, %s583_s25  ;;  %s180_s30 = sadd.s32 1, %s575_s23 }
   0x6   : > { %p33_p0 = scmp.ge.s32.totalorder %s31_s29, 2  ;;  %p190_p1 = scmp.ne.s32.totalorder %s575_s23, %s571_s22 }
   0x7   : > { %p191_p2 = scmp.eq.s32.totalorder %s439_s27, 1  ;;  %p196_p3 = scmp.ne.s32.totalorder %s571_s22, %s567_s21 }
   0x8   : > { %s752_s29 = smov (%p33_p0, %s31_s29), 0  ;;  %p197_p5 = scmp.eq.s32.totalorder %s440_s28, 1 }
   0x9   : > { %p665_p4 = por %p191_p2, %p190_p1  ;;  %s175_s8 = ssub.s32 %s583_s25, %s752_s29 }
   0xa   : > { %p443_p6 = scmp.ge.s32.totalorder %s587_s26, 1  ;;  %p178_p7 = scmp.eq.s32.totalorder %s175_s8, 0 }
   0xb   : > { %p672_p8 = por %p197_p5, %p196_p3  ;;  %p247_p9 = scmp.lt.s32.totalorder %s587_s26, 3 }
   0xc   : > { %s678_s10 = scalar_select %p178_p7, %s575_s23, %s180_s30  }
   0xd   : > { %p248_p10 = pnand %p443_p6, %p247_p9 }
   0xe   : > { %p286_p11 = scmp.lt.s32.totalorder (!%p248_p10), %s579_s24, 1  ;;  %s283_s13 = sand.u32 (!%p248_p10), 1, %s571_s22  }
   0xf   : > { %251 = sbr.rel (%p248_p10) target bundleno = 156 (0x9c), region = 44  ;;  %s444_s14 = sshll.u32 (!%p248_p10), %s283_s13, 3 }
  0x10   : > { %s448_s15 = sshll.u32 (!%p248_p10), %s579_s24, 3 }
  0x11   : > { %s348_s18 = scalar_lea.hbm (!%p248_p10), %s743_s6, %s448_s15 }
  0x12   : > { %s352_s27 = sshll.u32 (!%p248_p10), %s348_s18, 4  ;;  %s353_s27 = int_to_ptr.hbm [resolvable:$true] %s352_s27 }
  0x13   : > { %s523_s28 = sshra.s32 (!%p248_p10), %s353_s27, 4  ;;  %s524_s28 = int_to_ptr.hbm [resolvable:$true] %s523_s28 }
  0x14   : > { %v309_v0 = vld [vmem:[%s740_s3] sm:$0xff]  ;;  %v589_v2 = vmov 0   ;;  %s287_s19 = scalar_select %p286_p11, %s579_s24, 1  ;;  %vm334_vm0 = vcmask 130048  }
  0x15   : > { %v302_v1 = vld [vmem:[%s739_s2] sm:$0xff]  ;;  %508 = vset.pattern.permute.xlu1 %v589_v2  ;;  %507 = vset.pattern.permute.xlu0 %v589_v2  ;;  %s337_s24 = scalar_lea.sflag [#allocation3], %s283_s13  ;;  %p530_p1 = scmp.lt.s32.totalorder %s524_s28, %s743_s6 }
  0x16   : > { %312 = vperm.xlu1 %508, %v309_v0   ;;  %305 = vperm.xlu0 %507, %v302_v1   ;;  %v325_v3 = vld [vmem:[%s742_s5] sm:$0xff]  ;;  %s445_s20 = sshll.u32 %s287_s19, 2  ;;  %s285_s19 = scalar_lea.vmem [#allocation2], %s444_s14 }
  0x17   : > { %v318_v4 = vld [vmem:[%s741_s4] sm:$0xff]  ;;  %s292_s30 = scalar_lea.vmem %s737_s0, %s445_s20  ;;  %s299_s12 = scalar_lea.vmem %s738_s1, %s445_s20 }
  0x18   : > { %v300_v7 = vld [vmem:[%s292_s30] sm:$0xf]  ;;  %s350_s20 = sshll.u32 %s285_s19, 4  ;;  %s525_s30 = scalar_lea.hbm %s524_s28, 8  ;;  %s351_s20 = int_to_ptr.vmem [resolvable:$true] %s350_s20 }
  0x19   : > { %v316_v8 = vld [vmem:[%s299_s12] sm:$0xf]  ;;  %v301_v9 = vunpack.c.l.bf16 %v300_v7  ;;  %p526_p12 = scmp.ne.s32.totalorder %s524_s28, %s525_s30  ;;  %s529_s12 = scalar_lea.hbm %s743_s6, 16 }
  0x1a   : > { %v317_v10 = vunpack.c.l.bf16 %v316_v8  ;;  %p531_p2 = scmp.lt.s32.totalorder %s529_s12, %s525_s30 }
  0x1b   : > { %p527_p13 = pnand %p526_p12, %p665_p4 }
  0x1c   : > { %p532_p3 = por %p531_p2, %p530_p1 }
  0x1d   : > { %p528_p0 = pneg %p527_p13 }
  0x1e   : > { %328 = vperm.xlu1 %508, %v325_v3   ;;  %321 = vperm.xlu0 %507, %v318_v4  }
  0x1f   : > { %p533_p5 = pnand %p532_p3, %p528_p0 }
  0x88   : > { %v313_v5 = vpop.permute.xlu1 %312  ;;  %v306_v6 = vpop.permute.xlu0 %305 }
  0x89   : > { %v308_v11 = vmul.f32 %v306_v6, %v301_v9 }
  0x8b   : > { %v315_v15 = vadd.f32 %v313_v5, %v308_v11 }
  0x90   : > { %v322_v12 = vpop.permute.xlu0 %321  ;;  %v329_v14 = vpop.permute.xlu1 %328 }
  0x91   : > { %v324_v13 = vmul.f32 %v322_v12, %v317_v10 }
  0x93   : > { %v331_v16 = vadd.f32 %v329_v14, %v324_v13 }
  0x95   : > { %v332_v17 = vadd.f32 %v331_v16, %v315_v15 }
  0x97   : > { %v333_v18 = vmax.f32 %v332_v17, 0.0 }
  0x99   : > { %335 = vst.msk [vmem:[%s285_s19] sm:$0xff] %vm334_vm0, %v333_v18 }
  0x9a   : > { %536 = shalt.err (!%p533_p5)
}
  0x9b   : > { %451 = dma.vmem_to_hbm [thread:$0]  (%p665_p4), %s351_s20, 128, %s353_s27, %s337_s24  }
  0x9c PF: > { %p457_p6 = scmp.ge.s32.totalorder %s587_s26, 2  ;;  %s364_s13 = sand.u32 1, %s567_s21  }
  0x9d   : > { %s365_s16 = scalar_lea.sflag [#allocation3], %s364_s13 }
  0x9e   : > { %p454_p7 = pnand %p457_p6, %p672_p8 }
  0xa0   : > { %p455_p9 = pneg %p454_p7 }
  0xa2   : > { %562 = dma.done.wait (%p455_p9), %s365_s16, 128  }
  0xa3   : > { %564 = vsyncadd (%p455_p9), %s365_s16, 4294967168  ;;  %s19_s26 = sadd.s32 1, %s587_s26   ;;  %s746_s21 = smov %s571_s22 }
  0xa4   : > { %p16_p10 = scmp.ge.s32.totalorder %s19_s26, 4   ;;  %s747_s22 = smov %s575_s23 }
  0xa5   : > { %s748_s23 = smov %s678_s10  ;;  %s749_s24 = smov %s583_s25 }
  0xa6   : > { %s750_s25 = smov %s752_s29  ;;  %18 = sbr.rel (!%p16_p10) target bundleno = 4 (0x4), region = 82 }
  0xab   :  { %371 = vsyncpa [#allocation3], 1 }
  0xac   :  { %373 = vsyncpa [#allocation3 + $0x1], 1 }

// kernel: residual_forward.4
= control target key start
LH: loop header
LB: loop body
LE: loop exit
PB: predicated region body
PF: predicated region fallthrough
CT: control target
= control target key end

     0   :  { %s645_s21 = smov 0   ;;  %s647_s22 = smov 0   ;;  %s700_s0 = inlined_call_operand.vmem [shape: bf16[2,8,16], index: 0, kind: input, shape index: {}]   ;;  %s701_s1 = inlined_call_operand.vmem [shape: bf16[2,8,2], index: 1, kind: input, shape index: {}]   ;;  %s702_s2 = inlined_call_operand.vmem [shape: f32[8,1], index: 2, kind: input, shape index: {}]   ;;  %s703_s3 = inlined_call_operand.vmem [shape: f32[8,1], index: 3, kind: input, shape index: {}]   ;;  %s704_s4 = inlined_call_operand.vmem [shape: bf16[8,24], index: 4, kind: input, shape index: {}]   ;;  %s705_s5 = inlined_call_operand.vmem [shape: bf16[2,8,16], index: 5, kind: output, shape index: {0}]   ;;  %s706_s6 = inlined_call_operand.vmem [shape: f32[2,8,2], index: 6, kind: output, shape index: {1}]  }
   0x1   :  { %s649_s1 = smov 0  }
   0x2 LB: > { %s29_s23 = sadd.s32 1, %s598_s22  ;;  %p541_p0 = scmp.ge.s32.totalorder %s602_s1, 1  ;;  %s602_s1 = sphi %s649_s1, %s17_s1   ;;  %s598_s22 = sphi %s647_s22, %s708_s22   ;;  %s594_s21 = sphi %s645_s21, %s707_s21  }
   0x3   : > { %p31_p1 = scmp.ge.s32.totalorder %s29_s23, 2  ;;  %p248_p2 = scmp.lt.s32.totalorder %s602_s1, 3 }
   0x5   : > { %s710_s23 = smov (%p31_p1, %s29_s23), 0  ;;  %p249_p3 = pnand %p541_p0, %p248_p2 }
   0x6   : > { %p292_p4 = scmp.lt.s32.totalorder (!%p249_p3), %s594_s21, 1  ;;  %s605_s8 = smov (!%p249_p3), 1  }
   0x7   : > { %252 = sbr.rel (%p249_p3) target bundleno = 621 (0x26d), region = 40  ;;  %s607_s9 = smov (!%p249_p3), 16  }
   0x8   : > { %s608_s10 = smov (!%p249_p3), 126   ;;  %s609_s11 = smov (!%p249_p3), 127  }
   0xc   : > { %v319_v0 = vld [vmem:[%s702_s2] sm:$0xff]  ;;  %v604_v1 = vmov 0   ;;  %s712_s21 = smov (!%p292_p4, %s594_s21), 1  ;;  %v606_v13 = vmov 0.0|0.0   ;;  %vm364_vm0 = vcmask 7168   ;;  %vm368_vm1 = vcmask 138240  }
   0xd   : > { %579 = vset.pattern.permute.xlu0 %v604_v1  ;;  %v320_v2 = vld [vmem:[%s703_s3] sm:$0xff]  ;;  %s542_s28 = sshll.u32 %s712_s21, 2  ;;  %v360_v14 = vunpack.c.l.b16 %v606_v13  ;;  %vm377_vm2 = vcmask 1043456   ;;  %vm382_vm3 = vcmask 195584   ;;  %vm405_vm4 = vcmask 130048   ;;  %s545_s17 = sshll.u32 %s712_s21, 3 }
   0xe   : > { %325 = vperm.xlu0 %579, %v319_v0   ;;  %s298_s7 = scalar_lea.vmem %s700_s0, %s542_s28  ;;  %v381_v25 = vld [vmem:[%s704_s4] sm:$0xf]  ;;  %s311_s16 = scalar_lea.vmem %s705_s5, %s542_s28  ;;  %vm403_vm5 = vcmask 125952   ;;  %vm414_vm6 = vcmask 15360  }
   0xf   : > { %v321_v4 = vld [vmem:[%s298_s7] sm:$0xf]  ;;  %v361_v15 = vpack.c.b16 %v360_v14, %v360_v14  ;;  %s316_s20 = scalar_lea.vmem %s706_s6, %s545_s17 }
  0x10   : > { %v322_v5 = vunpack.c.l.bf16 %v321_v4 }
  0x16   : > { %331 = vperm.xlu0 %579, %v320_v2  }
  0x80   : > { %v326_v3 = vpop.permute.xlu0 %325 }
  0x81   : > { %v328_v6 = vmul.f32 %v326_v3, %v322_v5 }
  0x88   : > { %v332_v7 = vpop.permute.xlu0 %331 }
  0x89   : > { %v334_v8 = vadd.f32 %v332_v7, %v328_v6 }
  0x8b   : > { %v335_v9 = vmax.f32 %v334_v8, 0.0 }
  0x8d   : > { %v351_v10 = vpack.c.bf16 %v335_v9, %v335_v9 }
  0x8f   : > { %v355_v11 = vunpack.c.l.b16 %v351_v10 }
  0x91   : > { %v356_v12 = vpack.c.b16 %v355_v11, %v355_v11 }
  0x93   : > { %357 = vrot.lane.b32.xlu1 %v356_v12, %s605_s8 }
  0x9b   : > { %362 = vrot.lane.b32.xlu1 %v361_v15, %s607_s9 }
 0x105   : > { %v358_v16 = vpop.permute.xlu1 %357 }
 0x106   : > { %v367_v17 = vsel %vm364_vm0, 0.0|0.0, %v358_v16 }
 0x10d   : > { %v363_v18 = vpop.permute.xlu1 %362 }
 0x10e   : > { %v370_v19 = vsel %vm368_vm1, %v367_v17, %v363_v18 }
 0x10f   : > { %375 = vrot.lane.b32.xlu2 %v370_v19, %s608_s10  ;;  %v372_v20 = vrot.slane %v370_v19, 4 }
 0x117   : > { %373 = vrot.lane.b32.xlu2 %v372_v20, %s609_s11 }
 0x169   : > { %v376_v21 = vpop.permute.xlu2 %375 }
 0x16a   : > { %v387_v22 = vsel %vm377_vm2, %v376_v21, 0 }
 0x16b   : > { %395 = vmatpush.bf16.msra.mxu0 %v387_v22 }
 0x171   : > { %v374_v23 = vpop.permute.xlu2 %373 }
 0x172   : > { %v379_v24 = vsel %vm377_vm2, %v370_v19, %v374_v23 }
 0x173   : > { %396 = vmatpush.bf16.msra.mxu0 %v379_v24 }
 0x176   : > { %546 = vmatmul.msk.bf16.vlgmr.msra.gmra.mxu0 %vm382_vm3, %v381_v25 }
 0x1f3   : > { %v398_v26 = vpop.f32.mrf.mxu0 }
 0x1f4   : > { %v402_v27 = vpack.c.bf16 %v398_v26, %v398_v26  ;;  %v406_v28 = vsel %vm405_vm4, %v398_v26, 0.0  ;;  %v409_v29 = vmul.f32 %v398_v26, %v398_v26 }
 0x1f5   : > { %407 = vadd.xlane.f32.xlu0 %v406_v28 }
 0x1f6   : > { %404 = vst.msk [vmem:[%s311_s16] sm:$0xf] %vm403_vm5, %v402_v27  ;;  %v410_v30 = vsel %vm405_vm4, %v409_v29, 0.0 }
 0x1f7   : > { %411 = vadd.xlane.f32.xlu1 %v410_v30 }
 0x1fb   : > { %v400_v31 = vpop.f32.mrf.mxu0 }
 0x268   : > { %v408_v32 = vpop.xlane.xlu0 %407 }
 0x26a   : > { %v412_v33 = vpop.xlane.xlu1 %411 }
 0x26b   : > { %v413_v34 = vsel %vm364_vm0, %v408_v32, %v412_v33 }
 0x26c   : > { %415 = vst.msk [vmem:[%s316_s20] sm:$0xff] %vm414_vm6, %v413_v34 }
 0x26d PF: > { %s17_s1 = sadd.s32 1, %s602_s1   ;;  %s707_s21 = smov %s598_s22 }
 0x26e   : > { %p14_p5 = scmp.ge.s32.totalorder %s17_s1, 4   ;;  %s708_s22 = smov %s710_s23 }
 0x270   :  { %16 = sbr.rel (!%p14_p5) target bundleno = 2 (0x2), region = 85 }

// kernel: residual_forward.3
= control target key start
LH: loop header
LB: loop body
LE: loop exit
PB: predicated region body
PF: predicated region fallthrough
CT: control target
= control target key end

     0   :  { %s706_s21 = smov 0   ;;  %s708_s22 = smov 0   ;;  %s768_s0 = inlined_call_operand.vmem [shape: f32[2,4,16], index: 0, kind: input, shape index: {}]   ;;  %s769_s1 = inlined_call_operand.vmem [shape: f32[2,4,2], index: 1, kind: input, shape index: {}]   ;;  %s770_s2 = inlined_call_operand.vmem [shape: bf16[8,12], index: 2, kind: input, shape index: {}]   ;;  %s771_s3 = inlined_call_operand.vmem [shape: bf16[8,4], index: 3, kind: input, shape index: {}]   ;;  %s772_s4 = inlined_call_operand.vmem [shape: bf16[2,8,16], index: 4, kind: output, shape index: {0}]   ;;  %s773_s5 = inlined_call_operand.vmem [shape: bf16[2,8,16], index: 5, kind: output, shape index: {1}]   ;;  %s774_s6 = inlined_call_operand.vmem [shape: f32[2,8,4], index: 6, kind: output, shape index: {2}]  }
   0x1   :  { %s710_s23 = smov 0  }
   0x2 LB: > { %s29_s24 = sadd.s32 1, %s661_s22  ;;  %p605_p0 = scmp.ge.s32.totalorder %s665_s23, 1  ;;  %s665_s23 = sphi %s710_s23, %s17_s23   ;;  %s661_s22 = sphi %s708_s22, %s776_s22   ;;  %s657_s21 = sphi %s706_s21, %s775_s21  }
   0x3   : > { %p31_p1 = scmp.ge.s32.totalorder %s29_s24, 2  ;;  %p252_p2 = scmp.lt.s32.totalorder %s665_s23, 3 }
   0x5   : > { %s778_s24 = smov (%p31_p1, %s29_s24), 0  ;;  %p253_p3 = pnand %p605_p0, %p252_p2 }
   0x6   : > { %p303_p4 = scmp.lt.s32.totalorder (!%p253_p3), %s657_s21, 1  ;;  %s667_s8 = smov (!%p253_p3), 1  }
   0x7   : > { %256 = sbr.rel (%p253_p3) target bundleno = 531 (0x213), region = 36  ;;  %s668_s9 = smov (!%p253_p3), 16  }
   0x8   : > { %s669_s10 = smov (!%p253_p3), 127   ;;  %s670_s11 = smov (!%p253_p3), 126  }
   0xc   : > { %s780_s21 = smov (!%p303_p4, %s657_s21), 1  ;;  %vm351_vm0 = vcmask 7168   ;;  %vm355_vm1 = vcmask 138240   ;;  %vm365_vm2 = vcmask 1041408   ;;  %v392_v15 = vld [vmem:[%s771_s3] sm:$0xf] }
   0xd   : > { %s727_s25 = sshll.u32 %s780_s21, 2  ;;  %vm393_vm3 = vcmask 31744   ;;  %vm368_vm4 = vcmask 1043456   ;;  %vm376_vm5 = vcmask 1045504   ;;  %v371_v21 = vld [vmem:[%s770_s2] sm:$0xf] }
   0xe   : > { %s309_s28 = scalar_lea.vmem %s768_s0, %s727_s25  ;;  %s314_s7 = scalar_lea.vmem %s769_s1, %s727_s25  ;;  %vm372_vm6 = vcmask 97280   ;;  %vm414_vm7 = vcmask 125952   ;;  %vm418_vm8 = vcmask 130048   ;;  %vm434_vm9 = vcmask 15360  }
   0xf   : > { %v337_v0 = vld [vmem:[%s309_s28] sm:$0xf]  ;;  %s329_s18 = scalar_lea.vmem %s773_s5, %s727_s25  ;;  %s322_s26 = scalar_lea.vmem %s772_s4, %s727_s25  ;;  %vm436_vm10 = vcmask 23552  }
  0x10   : > { %v339_v1 = vld [vmem:[%s314_s7] sm:$0xf]  ;;  %v338_v2 = vpack.c.bf16 %v337_v0, %v337_v0  ;;  %s610_s27 = sshll.u32 %s780_s21, 3 }
  0x11   : > { %v340_v4 = vpack.c.bf16 %v339_v1, %v339_v1  ;;  %s334_s29 = scalar_lea.vmem %s774_s6, %s610_s27 }
  0x12   : > { %v342_v3 = vunpack.c.l.b16 %v338_v2  ;;  %v398_v14 = vsel %vm365_vm2, %v338_v2, 0 }
  0x13   : > { %v347_v6 = vunpack.c.l.b16 %v340_v4  ;;  %407 = vmatpush.bf16.msra.mxu1 %v398_v14 }
  0x14   : > { %v343_v5 = vpack.c.b16 %v342_v3, %v342_v3 }
  0x15   : > { %v348_v7 = vpack.c.b16 %v347_v6, %v347_v6 }
  0x16   : > { %344 = vrot.lane.b32.xlu0 %v343_v5, %s667_s8  ;;  %612 = vmatmul.msk.bf16.vlgmr.msra.gmra.mxu1 %vm393_vm3, %v392_v15 }
  0x1e   : > { %349 = vrot.lane.b32.xlu0 %v348_v7, %s668_s9 }
  0x88   : > { %v345_v8 = vpop.permute.xlu0 %344 }
  0x89   : > { %v354_v9 = vsel %vm351_vm0, %v340_v4, %v345_v8 }
  0x90   : > { %v350_v10 = vpop.permute.xlu0 %349 }
  0x91   : > { %v357_v11 = vsel %vm355_vm1, %v354_v9, %v350_v10 }
  0x92   : > { %v359_v12 = vrot.slane %v357_v11, 6  ;;  %v362_v13 = vrot.slane %v357_v11, 4 }
  0x93   : > { %v409_v22 = vpop.f32.mrf.mxu1 }
  0x94   : > { %360 = vrot.lane.b32.xlu1 %v359_v12, %s669_s10  ;;  %v416_v23 = vpack.c.bf16 %v409_v22, %v409_v22  ;;  %v426_v25 = vsel %vm418_vm8, %v409_v22, 0.0  ;;  %v429_v26 = vmul.f32 %v409_v22, %v409_v22 }
  0x95   : > { %427 = vadd.xlane.f32.xlu0 %v426_v25 }
  0x96   : > { %417 = vst.msk [vmem:[%s329_s18] sm:$0xf] %vm414_vm7, %v416_v23  ;;  %v430_v27 = vsel %vm418_vm8, %v429_v26, 0.0 }
  0x9b   : > { %v411_v24 = vpop.f32.mrf.mxu1 }
  0x9c   : > { %363 = vrot.lane.b32.xlu1 %v362_v13, %s670_s11 }
  0xc6   : > { %431 = vadd.xlane.f32.xlu1 %v430_v27 }
 0x106   : > { %v361_v16 = vpop.permute.xlu1 %360 }
 0x107   : > { %v367_v17 = vsel %vm365_vm2, %v357_v11, %v361_v16 }
 0x108   : > { %v428_v35 = vpop.xlane.xlu0 %427 }
 0x10e   : > { %v364_v18 = vpop.permute.xlu1 %363 }
 0x10f   : > { %v370_v19 = vsel %vm368_vm4, %v367_v17, %v364_v18 }
 0x110   : > { %v377_v20 = vsel %vm376_vm5, %v370_v19, 0 }
 0x111   : > { %386 = vmatpush.bf16.msra.mxu0 %v377_v20 }
 0x114   : > { %611 = vmatmul.msk.bf16.vlgmr.msra.gmra.mxu0 %vm372_vm6, %v371_v21 }
 0x139   : > { %v432_v37 = vpop.xlane.xlu1 %431 }
 0x191   : > { %v388_v28 = vpop.f32.mrf.mxu0 }
 0x192   : > { %v413_v29 = vpack.c.bf16 %v388_v28, %v388_v28  ;;  %v419_v30 = vsel %vm418_vm8, %v388_v28, 0.0  ;;  %v422_v31 = vmul.f32 %v388_v28, %v388_v28 }
 0x193   : > { %420 = vadd.xlane.f32.xlu2 %v419_v30 }
 0x194   : > { %415 = vst.msk [vmem:[%s322_s26] sm:$0xf] %vm414_vm7, %v413_v29  ;;  %v423_v33 = vsel %vm418_vm8, %v422_v31, 0.0 }
 0x199   : > { %v390_v32 = vpop.f32.mrf.mxu0 }
 0x19b   : > { %424 = vadd.xlane.f32.xlu2 %v423_v33 }
 0x206   : > { %v421_v34 = vpop.xlane.xlu2 %420 }
 0x20e   : > { %v425_v36 = vpop.xlane.xlu2 %424 }
 0x20f   : > { %v433_v38 = vsel %vm351_vm0, %v421_v34, %v425_v36 }
 0x210   : > { %v435_v39 = vsel %vm434_vm9, %v433_v38, %v428_v35 }
 0x211   : > { %v437_v40 = vsel %vm436_vm10, %v435_v39, %v432_v37 }
 0x212   : > { %438 = vst.msk [vmem:[%s334_s29] sm:$0xff] %vm393_vm3, %v437_v40 }
 0x213 PF: > { %s17_s23 = sadd.s32 1, %s665_s23   ;;  %s775_s21 = smov %s661_s22 }
 0x214   : > { %p14_p5 = scmp.ge.s32.totalorder %s17_s23, 4   ;;  %s776_s22 = smov %s778_s24 }
 0x216   :  { %16 = sbr.rel (!%p14_p5) target bundleno = 2 (0x2), region = 93 }

</bundles_post_ra>
